<compile_context>
chip_gen: v6e
topology: v6e:2x2x1
jax: 0.10.0
libtpu: 0.0.40
codegen_flags: <defaults>
</compile_context>

<pallas_src>
import jax
import jax.numpy as jnp
from jax.experimental import pallas as pl
from jax.experimental.pallas import tpu as pltpu


def _head_kernel(x_ref, w1_ref, b1_ref, w2_ref, b2_ref, o_ref):
    # x_ref:  (tb, H)   input tile (any float dtype; cast to MXU dtype in-kernel)
    # w1_ref: (H, H)    dense.weight, pre-transposed to (in, out), bf16
    # b1_ref: (1, H)    dense.bias, f32
    # w2_ref: (H, Lp)   out_proj.weight, pre-transposed to (in, out), label dim zero-padded, bf16
    # b2_ref: (1, Lp)   out_proj.bias, zero-padded, f32
    # o_ref:  (tb, L)   narrow output block (L = true num_labels)
    L = o_ref.shape[1]

    x = x_ref[...].astype(w1_ref.dtype)                       # free VPU cast, single-pass MXU
    h = jnp.dot(x, w1_ref[...], preferred_element_type=jnp.float32)
    h = jnp.tanh(h + b1_ref[...])                              # f32 bias + tanh (EUP)

    out = jnp.dot(h.astype(w2_ref.dtype), w2_ref[...],
                  preferred_element_type=jnp.float32)
    out = out + b2_ref[...]
    o_ref[...] = out[:, :L].astype(o_ref.dtype)                # narrow (masked) store, no pad writeback


def prepare_params(w1, b1, w2, b2, *, compute_dtype=jnp.bfloat16):
    """One-time parameter preprocessing (do this at model init, not per call).

    w1: (H, H)  dense.weight   (out, in)  PyTorch layout
    b1: (H,)    dense.bias
    w2: (L, H)  out_proj.weight(out, in)  PyTorch layout
    b2: (L,)    out_proj.bias
    """
    H = w1.shape[1]
    L = w2.shape[0]
    Lp = pl.cdiv(L, 128) * 128                                  # lane-pad label dim for the MXU

    w1t = jnp.asarray(w1).T.astype(compute_dtype)               # (H, H) (in, out)
    b1r = jnp.asarray(b1).reshape(1, H).astype(jnp.float32)     # (1, H)
    w2t = jnp.zeros((H, Lp), compute_dtype).at[:, :L].set(
        jnp.asarray(w2).T.astype(compute_dtype))                # (H, Lp) (in, out), padded
    b2r = jnp.zeros((1, Lp), jnp.float32).at[0, :L].set(
        jnp.asarray(b2).astype(jnp.float32))                    # (1, Lp), padded
    return (w1t, b1r, w2t, b2r, L)


def _default_tb(B, cap=1024):
    if B <= cap:
        return B
    # Largest multiple-of-8 divisor of B that is <= cap; fall back to B.
    for cand in range(cap - (cap % 8), 7, -8):
        if B % cand == 0:
            return cand
    return B


def classification_head(x, params, *, tb=None):
    """Eval-mode ClassificationHead forward.

    x:      (B, H)
    params: output of prepare_params() — preprocessed once at init.
    """
    w1t, b1r, w2t, b2r, L = params
    B, H = x.shape
    Lp = w2t.shape[1]

    if tb is None:
        tb = _default_tb(B)
    assert B % tb == 0, "batch must be divisible by tile size"

    grid = (B // tb,)
    return pl.pallas_call(
        _head_kernel,
        out_shape=jax.ShapeDtypeStruct((B, L), x.dtype),
        grid_spec=pltpu.PrefetchScalarGridSpec(
            num_scalar_prefetch=0,
            grid=grid,
            in_specs=[
                pl.BlockSpec((tb, H), lambda i: (i, 0)),     # x tile over batch
                pl.BlockSpec((H, H), lambda i: (0, 0)),      # W1 (in,out), resident
                pl.BlockSpec((1, H), lambda i: (0, 0)),      # b1
                pl.BlockSpec((H, Lp), lambda i: (0, 0)),     # W2 (in,out) padded, resident
                pl.BlockSpec((1, Lp), lambda i: (0, 0)),     # b2 padded
            ],
            out_specs=pl.BlockSpec((tb, L), lambda i: (i, 0)),  # narrow (B, L) output
        ),
        compiler_params=pltpu.CompilerParams(
            dimension_semantics=("parallel",)),
    )(x, w1t, b1r, w2t, b2r)


def reference(x, w1, b1, w2, b2):
    h = jnp.tanh(x @ w1.T + b1)
    return h @ w2.T + b2


if __name__ == "__main__":
    # config: hidden_size=32, num_labels=4; batch of 16 pooled features.
    B, H, L = 16, 32, 4
    key = jax.random.PRNGKey(0)
    kx, kw1, kb1, kw2, kb2 = jax.random.split(key, 5)

    x = jax.random.normal(kx, (B, H), dtype=jnp.float32)
    w1 = jax.random.normal(kw1, (H, H), dtype=jnp.float32) * 0.05   # dense.weight (out,in)
    b1 = jax.random.normal(kb1, (H,), dtype=jnp.float32) * 0.05     # dense.bias
    w2 = jax.random.normal(kw2, (L, H), dtype=jnp.float32) * 0.05   # out_proj.weight (out,in)
    b2 = jax.random.normal(kb2, (L,), dtype=jnp.float32) * 0.05     # out_proj.bias

    params = prepare_params(w1, b1, w2, b2)          # one-time init-side preprocessing
    out = classification_head(x, params)
    out = jax.block_until_ready(out)

    ref = reference(x, w1, b1, w2, b2)
    assert out.shape == (B, L)
    # bf16 MXU operands with f32 accumulation: loosen tolerance vs the f32 reference.
    assert jnp.allclose(out, ref, atol=2e-2, rtol=2e-2), "mismatch vs reference"
    print("KERNEL_OK")
</pallas_src>

<mosaic_0001>
module attributes {stable_mosaic.version = 11 : i64} {
  func.func @_head_kernel(%arg0: i32, %arg1: memref<16x32xf32, #tpu.memory_space<vmem>>, %arg2: memref<32x32xbf16, #tpu.memory_space<vmem>>, %arg3: memref<1x32xf32, #tpu.memory_space<vmem>>, %arg4: memref<32x128xbf16, #tpu.memory_space<vmem>>, %arg5: memref<1x128xf32, #tpu.memory_space<vmem>>, %arg6: memref<16x4xf32, #tpu.memory_space<vmem>>) attributes {dimension_semantics = [#tpu.dimension_semantics<parallel>], iteration_bounds = array<i64: 1>, scalar_prefetch = 0 : i64, scratch_operands = 0 : i64, tpu.core_type = #tpu.core_type<tc>, window_params = [{transform_indices = @transform_0, window_bounds = array<i64: 16, 32>}, {pipeline_mode = #tpu.pipeline_mode<synchronous>, transform_indices = @transform_1, window_bounds = array<i64: 32, 32>}, {pipeline_mode = #tpu.pipeline_mode<synchronous>, transform_indices = @transform_2, window_bounds = array<i64: 1, 32>}, {pipeline_mode = #tpu.pipeline_mode<synchronous>, transform_indices = @transform_3, window_bounds = array<i64: 32, 128>}, {pipeline_mode = #tpu.pipeline_mode<synchronous>, transform_indices = @transform_4, window_bounds = array<i64: 1, 128>}, {transform_indices = @transform_5, window_bounds = array<i64: 16, 4>}]} {
    %c0 = arith.constant 0 : index
    %c0_0 = arith.constant 0 : index
    %0 = vector.load %arg1[%c0, %c0_0] : memref<16x32xf32, #tpu.memory_space<vmem>>, vector<16x32xf32>
    %1 = arith.truncf %0 : vector<16x32xf32> to vector<16x32xbf16>
    %c0_1 = arith.constant 0 : index
    %c0_2 = arith.constant 0 : index
    %2 = vector.load %arg2[%c0_1, %c0_2] : memref<32x32xbf16, #tpu.memory_space<vmem>>, vector<32x32xbf16>
    %cst = arith.constant dense<0.000000e+00> : vector<16x32xf32>
    %3 = tpu.matmul %1, %2, %cst {dimension_numbers = #tpu.dot_dimension_numbers<[1], [0], [0], [1], [0, 0, 1, 1], [], []>} : vector<16x32xbf16>, vector<32x32xbf16>, vector<16x32xf32> -> vector<16x32xf32>
    %c0_3 = arith.constant 0 : index
    %c0_4 = arith.constant 0 : index
    %4 = vector.load %arg3[%c0_3, %c0_4] : memref<1x32xf32, #tpu.memory_space<vmem>>, vector<1x32xf32>
    %5 = vector.broadcast %4 : vector<1x32xf32> to vector<16x32xf32>
    %6 = arith.addf %3, %5 : vector<16x32xf32>
    %7 = math.tanh %6 : vector<16x32xf32>
    %8 = arith.truncf %7 : vector<16x32xf32> to vector<16x32xbf16>
    %c0_5 = arith.constant 0 : index
    %c0_6 = arith.constant 0 : index
    %9 = vector.load %arg4[%c0_5, %c0_6] : memref<32x128xbf16, #tpu.memory_space<vmem>>, vector<32x128xbf16>
    %cst_7 = arith.constant dense<0.000000e+00> : vector<16x128xf32>
    %10 = tpu.matmul %8, %9, %cst_7 {dimension_numbers = #tpu.dot_dimension_numbers<[1], [0], [0], [1], [0, 0, 1, 1], [], []>} : vector<16x32xbf16>, vector<32x128xbf16>, vector<16x128xf32> -> vector<16x128xf32>
    %c0_8 = arith.constant 0 : index
    %c0_9 = arith.constant 0 : index
    %11 = vector.load %arg5[%c0_8, %c0_9] : memref<1x128xf32, #tpu.memory_space<vmem>>, vector<1x128xf32>
    %12 = vector.broadcast %11 : vector<1x128xf32> to vector<16x128xf32>
    %13 = arith.addf %10, %12 : vector<16x128xf32>
    %14 = vector.extract_strided_slice %13 {offsets = [0, 0], sizes = [16, 4], strides = [1, 1]} : vector<16x128xf32> to vector<16x4xf32>
    %c0_10 = arith.constant 0 : index
    %c0_11 = arith.constant 0 : index
    %15 = vector.load %arg6[%c0_10, %c0_11] : memref<16x4xf32, #tpu.memory_space<vmem>>, vector<16x4xf32>
    tpu.vector_store %arg6[%c0_10, %c0_11], %14 {strides = array<i32>} : memref<16x4xf32, #tpu.memory_space<vmem>>, vector<16x4xf32>,
    return
  }
  func.func @transform_0(%arg0: i32) -> (i32, i32) {
    %c0_i32 = arith.constant 0 : i32
    %c0_i32_0 = arith.constant 0 : i32
    return %arg0, %c0_i32 : i32, i32
  }
  func.func @transform_1(%arg0: i32) -> (i32, i32) {
    %c0_i32 = arith.constant 0 : i32
    %c0_i32_0 = arith.constant 0 : i32
    %c0_i32_1 = arith.constant 0 : i32
    return %c0_i32, %c0_i32_0 : i32, i32
  }
  func.func @transform_2(%arg0: i32) -> (i32, i32) {
    %c0_i32 = arith.constant 0 : i32
    %c0_i32_0 = arith.constant 0 : i32
    %c0_i32_1 = arith.constant 0 : i32
    return %c0_i32, %c0_i32_0 : i32, i32
  }
  func.func @transform_3(%arg0: i32) -> (i32, i32) {
    %c0_i32 = arith.constant 0 : i32
    %c0_i32_0 = arith.constant 0 : i32
    %c0_i32_1 = arith.constant 0 : i32
    return %c0_i32, %c0_i32_0 : i32, i32
  }
  func.func @transform_4(%arg0: i32) -> (i32, i32) {
    %c0_i32 = arith.constant 0 : i32
    %c0_i32_0 = arith.constant 0 : i32
    %c0_i32_1 = arith.constant 0 : i32
    return %c0_i32, %c0_i32_0 : i32, i32
  }
  func.func @transform_5(%arg0: i32) -> (i32, i32) {
    %c0_i32 = arith.constant 0 : i32
    %c0_i32_0 = arith.constant 0 : i32
    return %arg0, %c0_i32 : i32, i32
  }
}

</mosaic_0001>

<bundles_post_ra>
// kernel: tpu_custom_call.1
= control target key start
LH: loop header
LB: loop body
LE: loop exit
PB: predicated region body
PF: predicated region fallthrough
CT: control target
= control target key end

     0   :  { %10 = vsyncpa [#allocation3], 0  ;;  %s385_s0 = inlined_call_operand.hbm [shape: f32[16,32], index: 0, kind: input, shape index: {}]   ;;  %s386_s1 = inlined_call_operand.hbm [shape: bf16[32,32], index: 1, kind: input, shape index: {}]   ;;  %s387_s2 = inlined_call_operand.vmem [shape: f32[1,32], index: 2, kind: input, shape index: {}]   ;;  %s388_s3 = inlined_call_operand.hbm [shape: bf16[32,128], index: 3, kind: input, shape index: {}]   ;;  %s389_s4 = inlined_call_operand.vmem [shape: f32[1,128], index: 4, kind: input, shape index: {}]   ;;  %s390_s5 = inlined_call_operand.vmem [shape: f32[16,4], index: 5, kind: output, shape index: {}]  }
   0x1   :  { %11 = vsyncpa [#allocation5], 0  ;;  %s323_s18 = smov [#allocation4]  }
   0x2   :  { %s29_s19 = sshll.u32 %s323_s18, 4  ;;  %s30_s19 = int_to_ptr.vmem [resolvable:$true] %s29_s19 }
   0x3   :  { %s267_s20 = scalar_lea.vmem %s30_s19, 256  ;;  %p272_p1 = scmp.lt.s32.totalorder %s30_s19, %s30_s19 }
   0x4   :  { %p268_p0 = scmp.ne.s32.totalorder %s30_s19, %s267_s20  ;;  %p273_p2 = scmp.lt.s32.totalorder %s267_s20, %s267_s20 }
   0x6   :  { %p274_p3 = por %p273_p2, %p272_p1 }
   0x8   :  { %p275_p4 = pnand %p274_p3, %p268_p0 }
   0xa   :  { %278 = shalt.err (!%p275_p4)
}
   0xb   :  { %s324_s21 = smov 64   ;;  %s325_s22 = smov 4  }
   0xc   :  { %35 = dma.hbm_to_vmem [thread:$0]  %s386_s1, 256, %s30_s19, [#allocation5], %s324_s21, %s324_s21, %s325_s22  }
   0xd   :  { %s326_s25 = smov [#allocation2]  }
   0xe   :  { %s17_s26 = sshll.u32 %s326_s25, 4  ;;  %s18_s26 = int_to_ptr.vmem [resolvable:$true] %s17_s26 }
   0xf   :  { %s287_s27 = scalar_lea.vmem %s18_s26, 256  ;;  %p292_p6 = scmp.lt.s32.totalorder %s18_s26, %s18_s26 }
  0x10   :  { %p288_p5 = scmp.ne.s32.totalorder %s18_s26, %s287_s27  ;;  %p293_p7 = scmp.lt.s32.totalorder %s287_s27, %s287_s27 }
  0x12   :  { %p294_p8 = por %p293_p7, %p292_p6 }
  0x14   :  { %p295_p9 = pnand %p294_p8, %p288_p5 }
  0x16   :  { %298 = shalt.err (!%p295_p9)
}
  0x17   :  { %s327_s28 = smov 128   ;;  %s328_s29 = smov 8  }
  0x18   :  { %23 = dma.hbm_to_vmem [thread:$0]  %s385_s0, 256, %s18_s26, [#allocation3], %s327_s28, %s327_s28, %s328_s29  }
  0x19   :  { %s329_s7 = smov [#allocation6]  }
  0x1a   :  { %s43_s8 = sshll.u32 %s329_s7, 4  ;;  %s44_s8 = int_to_ptr.vmem [resolvable:$true] %s43_s8 }
  0x1b   :  { %s307_s1 = scalar_lea.vmem %s44_s8, 256  ;;  %p312_p11 = scmp.lt.s32.totalorder %s44_s8, %s44_s8 }
  0x1c   :  { %p308_p10 = scmp.ne.s32.totalorder %s44_s8, %s307_s1  ;;  %p313_p12 = scmp.lt.s32.totalorder %s307_s1, %s307_s1 }
  0x1e   :  { %p314_p13 = por %p313_p12, %p312_p11 }
  0x20   :  { %p315_p0 = pnand %p314_p13, %p308_p10 }
  0x22   :  { %318 = shalt.err (!%p315_p0)
}
  0x23   :  { %49 = dma.hbm_to_vmem [thread:$0]  %s388_s3, 256, %s44_s8, [#allocation5], %s324_s21, %s324_s21, %s325_s22  }
  0x24   :  { %319 = dma.done.wait [#allocation3], 256  }
  0x25   :  { %320 = vsyncadd [#allocation3], 4294967040 }
  0x26   :  { %321 = dma.done.wait [#allocation5], 512  }
  0x27   :  { %322 = vsyncadd [#allocation5], 4294966784  ;;  %v330_v0 = vmov 0.0   ;;  %vm331_vm0 = vmmov 0   ;;  %v251_v1 = vld [vmem:[#allocation4 + $0x8] sm:$0xff]   ;;  %v252_v2 = vld [vmem:[#allocation4] sm:$0xff]  }
  0x28   :  { %226 = vmatprep.subr.bf16.mxu0 %v330_v0  ;;  %230 = vmatprep.mubr.msk.bf16.mxu0 %vm331_vm0, %v330_v0  ;;  %v62_v3 = vld [vmem:[#allocation2] sm:$0xff]  ;;  %v63_v4 = vld [vmem:[#allocation2 + $0x8] sm:$0xff]  ;;  %vm88_vm1 = vcmask 261120   ;;  %vm203_vm2 = vcmask 31744  }
  0x29   :  { %234 = vmatprep.subr.bf16.mxu1 %v330_v0  ;;  %238 = vmatprep.mubr.msk.bf16.mxu1 %vm331_vm0, %v330_v0  ;;  %v64_v5 = vpack.c.bf16 %v63_v4, %v62_v3  ;;  %v253_v6 = vld [vmem:[#allocation6 + $0x8] sm:$0xff]   ;;  %v254_v7 = vld [vmem:[#allocation6] sm:$0xff]  }
  0x2a   :  { %227 = vmatpush3.bf16.msra.mxu0 %v251_v1  ;;  %235 = vmatpush3.bf16.msra.mxu1 %v253_v6  ;;  %v212_v8 = vld [vmem:[%s387_s2] ss:$0 sm:$0xff] }
  0x2b   :  { %228 = vmatprep.subr.bf16.mxu0 %v330_v0  ;;  %236 = vmatprep.subr.bf16.mxu1 %v330_v0  ;;  %v216_v18 = vld [vmem:[%s389_s4] ss:$0 sm:$0xff] }
  0x2e   :  { %229 = vmatpush3.bf16.msra.mxu0 %v252_v2  ;;  %237 = vmatpush3.bf16.msra.mxu1 %v254_v7 }
  0x31   :  { %231 = vmatmul.mubr.msk.bf16.vlgmr.msra.gmra.mxu0 %vm88_vm1, %v64_v5 }
  0xf1   :  { %v126_v9 = vpop.f32.mrf.mxu0 }
  0xf2   :  { %v127_v10 = vadd.f32 %v212_v8, %v126_v9 }
  0xf3   :  { %v232_v11 = vpop.f32.mrf.mxu0 }
  0xf4   :  { %255 = vtanh.f32 %v127_v10 }
  0xf5   :  { %v129_v12 = vpop.f32.mrf.mxu0 }
  0xf6   :  { %v130_v13 = vadd.f32 %v212_v8, %v129_v12 }
  0xf7   :  { %v233_v14 = vpop.f32.mrf.mxu0 }
  0xf8   :  { %257 = vtanh.f32 %v130_v13 }
 0x101   :  { %v256_v15 = vpop.eup %255 }
 0x105   :  { %v258_v16 = vpop.eup %257 }
 0x106   :  { %v135_v17 = vpack.c.bf16 %v258_v16, %v256_v15 }
 0x108   :  { %239 = vmatmul.mubr.msk.bf16.vlgmr.msra.gmra.mxu1 %vm88_vm1, %v135_v17 }
 0x1c8   :  { %v196_v19 = vpop.f32.mrf.mxu1 }
 0x1c9   :  { %v197_v20 = vadd.f32 %v216_v18, %v196_v19 }
 0x1ca   :  { %v240_v21 = vpop.f32.mrf.mxu1 }
 0x1cb   :  { %204 = vst.msk [vmem:[%s390_s5] sm:$0xff] %vm203_vm2, %v197_v20 }
 0x1cc   :  { %v199_v22 = vpop.f32.mrf.mxu1 }
 0x1cd   :  { %v200_v23 = vadd.f32 %v216_v18, %v199_v22 }
 0x1ce   :  { %v241_v24 = vpop.f32.mrf.mxu1 }
 0x1cf   :  { %205 = vst.msk [vmem:[%s390_s5 + $0x8] sm:$0xff] %vm203_vm2, %v200_v23 }
 0x1d0   :  { %210 = vsyncpa [#allocation3], 1 }
 0x1d1   :  { %211 = vsyncpa [#allocation5], 1 }

</bundles_post_ra>
